<compile_context>
chip_gen: v5e
topology: v5e:2x2
jax: 0.10.0
libtpu: 0.0.40
codegen_flags: <defaults>
</compile_context>

<pallas_src>
import jax
import jax.numpy as jnp
from jax.experimental import pallas as pl
from jax.experimental.pallas import tpu as pltpu

LANE = 128  # TPU lane width


def _round_up(x, m):
    return ((x + m - 1) // m) * m


def mlp_kernel(x_ref, w1_ref, b1_ref, w2_ref, b2_ref, o_ref):
    # x_ref : (TB, D_in)   w1_ref : (D_in, Hp)  b1_ref : (1, Hp)
    # w2_ref: (Hp, Cp)     b2_ref : (1, Cp)     o_ref  : (TB, Cp)
    h = jnp.dot(x_ref[...], w1_ref[...], preferred_element_type=jnp.float32)
    h = jnp.maximum(h + b1_ref[...], 0.0)                      # bias + ReLU (f32 VPU)
    out = jnp.dot(h, w2_ref[...], preferred_element_type=jnp.float32) + b2_ref[...]
    o_ref[...] = out.astype(o_ref.dtype)                        # lane-dense (Cp=128k) store


def mlp_forward(x_nchw, w1, b1, w2, b2, *, tb=None):
    """x_nchw: (B, C, H, W); w1: (D_in, hidden); w2: (hidden, classes)."""
    B = x_nchw.shape[0]
    d_in, hidden = w1.shape
    classes = w2.shape[1]

    # --- pad hidden / classes to the 128-lane width (zero pads are inert) ---
    Hp = _round_up(hidden, LANE)
    Cp = _round_up(classes, LANE)
    w1p = jnp.zeros((d_in, Hp), jnp.float32).at[:, :hidden].set(w1)
    b1p = jnp.zeros((1, Hp), jnp.float32).at[:, :hidden].set(b1.reshape(1, hidden))
    w2p = jnp.zeros((Hp, Cp), jnp.float32).at[:hidden, :classes].set(w2)
    b2p = jnp.zeros((1, Cp), jnp.float32).at[:, :classes].set(b2.reshape(1, classes))

    # --- flatten exactly like x.view(B, -1); pad batch to a sublane-aligned tile ---
    x_flat = x_nchw.reshape(B, d_in)
    if tb is None:
        tb = min(256, max(8, _round_up(B, 8)))   # multiple of 8 sublanes, cap 256 rows
    Bp = _round_up(B, tb)
    if Bp != B:
        x_flat = jnp.zeros((Bp, d_in), x_flat.dtype).at[:B].set(x_flat)

    grid = (Bp // tb,)

    # Keep weights resident (constant index_map, single-buffered); stream x/out tiles.
    w_spec = lambda shape: pl.BlockSpec(shape, lambda i: (0, 0),
                                        pipeline_mode=pl.Buffered(1))

    out = pl.pallas_call(
        mlp_kernel,
        out_shape=jax.ShapeDtypeStruct((Bp, Cp), jnp.float32),
        grid=grid,
        in_specs=[
            pl.BlockSpec((tb, d_in), lambda i: (i, 0)),   # x: streamed per batch tile
            w_spec((d_in, Hp)),                           # w1
            w_spec((1, Hp)),                              # b1
            w_spec((Hp, Cp)),                             # w2
            w_spec((1, Cp)),                              # b2
        ],
        out_specs=pl.BlockSpec((tb, Cp), lambda i: (i, 0)),
        compiler_params=pltpu.CompilerParams(
            dimension_semantics=("parallel",),            # shards across TCs on v7x
            vmem_limit_bytes=32 * 1024 * 1024,            # explicit, safe on v7x's 64 MiB
        ),
    )(x_flat, w1p, b1p, w2p, b2p)

    # Slice padded rows / padded class columns back off.
    return out[:B, :classes]


def init_params(key, channel, width, height, classes, hidden=100):
    # Mimic nn.Linear default init: uniform(-1/sqrt(fan_in), 1/sqrt(fan_in)).
    d_in = channel * width * height
    k1, k2, k3, k4 = jax.random.split(key, 4)
    bound1 = 1.0 / jnp.sqrt(d_in)
    bound2 = 1.0 / jnp.sqrt(hidden)
    # Stored (in, out) so the kernel computes x @ W + b (== PyTorch x @ W.T + b).
    w1 = jax.random.uniform(k1, (d_in, hidden), jnp.float32, -bound1, bound1)
    b1 = jax.random.uniform(k2, (1, hidden), jnp.float32, -bound1, bound1)
    w2 = jax.random.uniform(k3, (hidden, classes), jnp.float32, -bound2, bound2)
    b2 = jax.random.uniform(k4, (1, classes), jnp.float32, -bound2, bound2)
    return w1, b1, w2, b2


if __name__ == "__main__":
    channel, width, height, classes = 4, 16, 16, 10
    batch = 2

    key = jax.random.PRNGKey(0)
    kx, kp = jax.random.split(key)
    x = jax.random.normal(kx, (batch, channel, width, height), jnp.float32)  # NCHW
    w1, b1, w2, b2 = init_params(kp, channel, width, height, classes)

    out = mlp_forward(x, w1, b1, w2, b2)
    out = jax.block_until_ready(out)

    # Reference check in plain JAX (same math, unpadded weights).
    x_flat = x.reshape(batch, -1)
    ref = jnp.maximum(x_flat @ w1 + b1, 0.0) @ w2 + b2
    assert out.shape == (batch, classes)
    assert jnp.allclose(out, ref, atol=1e-4, rtol=1e-4)

    print("KERNEL_OK")
</pallas_src>

<mosaic_0001>
module attributes {stable_mosaic.version = 11 : i64} {
  func.func @mlp_kernel(%arg0: i32, %arg1: memref<8x1024xf32, #tpu.memory_space<vmem>>, %arg2: memref<1024x128xf32, #tpu.memory_space<vmem>>, %arg3: memref<1x128xf32, #tpu.memory_space<vmem>>, %arg4: memref<128x128xf32, #tpu.memory_space<vmem>>, %arg5: memref<1x128xf32, #tpu.memory_space<vmem>>, %arg6: memref<8x128xf32, #tpu.memory_space<vmem>>) attributes {dimension_semantics = [#tpu.dimension_semantics<parallel>], iteration_bounds = array<i64: 1>, scalar_prefetch = 0 : i64, scratch_operands = 0 : i64, tpu.core_type = #tpu.core_type<tc>, window_params = [{transform_indices = @transform_0, window_bounds = array<i64: 8, 1024>}, {pipeline_mode = #tpu.pipeline_mode<synchronous>, transform_indices = @transform_1, window_bounds = array<i64: 1024, 128>}, {pipeline_mode = #tpu.pipeline_mode<synchronous>, transform_indices = @transform_2, window_bounds = array<i64: 1, 128>}, {pipeline_mode = #tpu.pipeline_mode<synchronous>, transform_indices = @transform_3, window_bounds = array<i64: 128, 128>}, {pipeline_mode = #tpu.pipeline_mode<synchronous>, transform_indices = @transform_4, window_bounds = array<i64: 1, 128>}, {transform_indices = @transform_5, window_bounds = array<i64: 8, 128>}]} {
    %c0 = arith.constant 0 : index
    %c0_0 = arith.constant 0 : index
    %0 = vector.load %arg1[%c0, %c0_0] : memref<8x1024xf32, #tpu.memory_space<vmem>>, vector<8x1024xf32>
    %c0_1 = arith.constant 0 : index
    %c0_2 = arith.constant 0 : index
    %1 = vector.load %arg2[%c0_1, %c0_2] : memref<1024x128xf32, #tpu.memory_space<vmem>>, vector<1024x128xf32>
    %cst = arith.constant dense<0.000000e+00> : vector<8x128xf32>
    %2 = tpu.matmul %0, %1, %cst {dimension_numbers = #tpu.dot_dimension_numbers<[1], [0], [0], [1], [0, 0, 1, 1], [], []>} : vector<8x1024xf32>, vector<1024x128xf32>, vector<8x128xf32> -> vector<8x128xf32>
    %c0_3 = arith.constant 0 : index
    %c0_4 = arith.constant 0 : index
    %3 = vector.load %arg3[%c0_3, %c0_4] : memref<1x128xf32, #tpu.memory_space<vmem>>, vector<1x128xf32>
    %4 = vector.broadcast %3 : vector<1x128xf32> to vector<8x128xf32>
    %5 = arith.addf %2, %4 : vector<8x128xf32>
    %cst_5 = arith.constant 0.000000e+00 : f32
    %6 = vector.broadcast %cst_5 : f32 to vector<8x128xf32>
    %7 = arith.maximumf %5, %6 : vector<8x128xf32>
    %c0_6 = arith.constant 0 : index
    %c0_7 = arith.constant 0 : index
    %8 = vector.load %arg4[%c0_6, %c0_7] : memref<128x128xf32, #tpu.memory_space<vmem>>, vector<128x128xf32>
    %cst_8 = arith.constant dense<0.000000e+00> : vector<8x128xf32>
    %9 = tpu.matmul %7, %8, %cst_8 {dimension_numbers = #tpu.dot_dimension_numbers<[1], [0], [0], [1], [0, 0, 1, 1], [], []>} : vector<8x128xf32>, vector<128x128xf32>, vector<8x128xf32> -> vector<8x128xf32>
    %c0_9 = arith.constant 0 : index
    %c0_10 = arith.constant 0 : index
    %10 = vector.load %arg5[%c0_9, %c0_10] : memref<1x128xf32, #tpu.memory_space<vmem>>, vector<1x128xf32>
    %11 = vector.broadcast %10 : vector<1x128xf32> to vector<8x128xf32>
    %12 = arith.addf %9, %11 : vector<8x128xf32>
    %c0_11 = arith.constant 0 : index
    %c0_12 = arith.constant 0 : index
    %13 = vector.load %arg6[%c0_11, %c0_12] : memref<8x128xf32, #tpu.memory_space<vmem>>, vector<8x128xf32>
    tpu.vector_store %arg6[%c0_11, %c0_12], %12 {strides = array<i32>} : memref<8x128xf32, #tpu.memory_space<vmem>>, vector<8x128xf32>,
    return
  }
  func.func @transform_0(%arg0: i32) -> (i32, i32) {
    %c0_i32 = arith.constant 0 : i32
    %c0_i32_0 = arith.constant 0 : i32
    return %arg0, %c0_i32 : i32, i32
  }
  func.func @transform_1(%arg0: i32) -> (i32, i32) {
    %c0_i32 = arith.constant 0 : i32
    %c0_i32_0 = arith.constant 0 : i32
    %c0_i32_1 = arith.constant 0 : i32
    return %c0_i32, %c0_i32_0 : i32, i32
  }
  func.func @transform_2(%arg0: i32) -> (i32, i32) {
    %c0_i32 = arith.constant 0 : i32
    %c0_i32_0 = arith.constant 0 : i32
    %c0_i32_1 = arith.constant 0 : i32
    return %c0_i32, %c0_i32_0 : i32, i32
  }
  func.func @transform_3(%arg0: i32) -> (i32, i32) {
    %c0_i32 = arith.constant 0 : i32
    %c0_i32_0 = arith.constant 0 : i32
    %c0_i32_1 = arith.constant 0 : i32
    return %c0_i32, %c0_i32_0 : i32, i32
  }
  func.func @transform_4(%arg0: i32) -> (i32, i32) {
    %c0_i32 = arith.constant 0 : i32
    %c0_i32_0 = arith.constant 0 : i32
    %c0_i32_1 = arith.constant 0 : i32
    return %c0_i32, %c0_i32_0 : i32, i32
  }
  func.func @transform_5(%arg0: i32) -> (i32, i32) {
    %c0_i32 = arith.constant 0 : i32
    %c0_i32_0 = arith.constant 0 : i32
    return %arg0, %c0_i32 : i32, i32
  }
}

</mosaic_0001>

<bundles_post_ra>
// kernel: tpu_custom_call.1
= control target key start
LH: loop header
LB: loop body
LE: loop exit
PB: predicated region body
PF: predicated region fallthrough
CT: control target
= control target key end

     0   :  { %10 = vsyncpa [#allocation3], 0  ;;  %s590_s0 = inlined_call_operand.hbm [shape: f32[8,1024], index: 0, kind: input, shape index: {}]   ;;  %s591_s1 = inlined_call_operand.hbm [shape: f32[1024,128], index: 1, kind: input, shape index: {}]   ;;  %s592_s2 = inlined_call_operand.vmem [shape: f32[1,128], index: 2, kind: input, shape index: {}]   ;;  %s593_s3 = inlined_call_operand.hbm [shape: f32[128,128], index: 3, kind: input, shape index: {}]   ;;  %s594_s4 = inlined_call_operand.vmem [shape: f32[1,128], index: 4, kind: input, shape index: {}]   ;;  %s595_s5 = inlined_call_operand.hbm [shape: f32[8,128], index: 5, kind: output, shape index: {}]  }
   0x1   :  { %11 = vsyncpa [#allocation6], 0  ;;  %s28_s20 = sshll.u32 %s591_s1, 4  ;;  %s29_s20 = int_to_ptr.hbm [resolvable:$true] %s28_s20 }
   0x2   :  { %12 = vsyncpa [#allocation4], 0  ;;  %s536_s21 = smov [#allocation5]   ;;  %s18_s25 = sshll.u32 %s590_s0, 4  ;;  %s19_s25 = int_to_ptr.hbm [resolvable:$true] %s18_s25 }
   0x3   :  { %s30_s22 = sshll.u32 %s536_s21, 4  ;;  %s537_s26 = smov 128   ;;  %s31_s22 = int_to_ptr.vmem [resolvable:$true] %s30_s22 }
   0x4   :  { %s538_s27 = smov 8   ;;  %s539_s28 = smov [#allocation2]  }
   0x5   :  { %36 = dma.hbm_to_vmem [thread:$0]  %s29_s20, 16384, %s31_s22, [#allocation6], %s537_s26, %s537_s26, %s538_s27  }
   0x6   :  { %s20_s29 = sshll.u32 %s539_s28, 4  ;;  %s43_s7 = sshll.u32 %s593_s3, 4  ;;  %s21_s29 = int_to_ptr.vmem [resolvable:$true] %s20_s29  ;;  %s44_s7 = int_to_ptr.hbm [resolvable:$true] %s43_s7 }
   0x7   :  { %23 = dma.hbm_to_vmem [thread:$0]  %s19_s25, 1024, %s21_s29, [#allocation3]  }
   0x8   :  { %s540_s1 = smov [#allocation7]  }
   0x9   :  { %s45_s8 = sshll.u32 %s540_s1, 4  ;;  %s46_s8 = int_to_ptr.vmem [resolvable:$true] %s45_s8 }
   0xa   :  { %51 = dma.hbm_to_vmem [thread:$0]  %s44_s7, 2048, %s46_s8, [#allocation6], %s537_s26, %s537_s26, %s538_s27  }
   0xb   :  { %530 = dma.done.wait [#allocation3], 1024  }
   0xc   :  { %531 = vsyncadd [#allocation3], 4294966272 }
   0xd   :  { %532 = dma.done.wait [#allocation6], 18432  }
   0xe   :  { %533 = vsyncadd [#allocation6], 4294948864  ;;  %v121_v0 = vld [vmem:[#allocation5 + $0x178] sm:$0xff]  ;;  %v120_v2 = vld [vmem:[#allocation5 + $0x170] sm:$0xff]  ;;  %s541_s10 = smov [#allocation8]   ;;  %s415_s14 = sshll.u32 %s595_s5, 4  ;;  %s416_s14 = int_to_ptr.hbm [resolvable:$true] %s415_s14 }
   0xf   :  { %v89_v1 = vld [vmem:[#allocation5 + $0x78] sm:$0xff]  ;;  %246 = vmatpush.msra.mxu2 %v121_v0  ;;  %v88_v4 = vld [vmem:[#allocation5 + $0x70] sm:$0xff]  ;;  %v119_v6 = vld [vmem:[#allocation5 + $0x168] sm:$0xff]  ;;  %s413_s11 = sshll.u32 %s541_s10, 4  ;;  %s414_s11 = int_to_ptr.vmem [resolvable:$true] %s413_s11 }
  0x10   :  { %206 = vmatpush.msra.mxu0 %v89_v1  ;;  %v137_v3 = vld [vmem:[#allocation5 + $0x1f8] sm:$0xff]  ;;  %v136_v7 = vld [vmem:[#allocation5 + $0x1f0] sm:$0xff]  ;;  %v87_v8 = vld [vmem:[#allocation5 + $0x68] sm:$0xff] }
  0x11   :  { %v105_v5 = vld [vmem:[#allocation5 + $0xf8] sm:$0xff]  ;;  %266 = vmatpush.msra.mxu3 %v137_v3  ;;  %247 = vmatpush.msra.mxu2 %v120_v2  ;;  %v104_v9 = vld [vmem:[#allocation5 + $0xf0] sm:$0xff]  ;;  %v135_v10 = vld [vmem:[#allocation5 + $0x1e8] sm:$0xff] }
  0x12   :  { %226 = vmatpush.msra.mxu1 %v105_v5  ;;  %207 = vmatpush.msra.mxu0 %v88_v4  ;;  %v118_v11 = vld [vmem:[#allocation5 + $0x160] sm:$0xff]  ;;  %v103_v13 = vld [vmem:[#allocation5 + $0xe8] sm:$0xff]  ;;  %v117_v16 = vld [vmem:[#allocation5 + $0x158] sm:$0xff] }
  0x13   :  { %267 = vmatpush.msra.mxu3 %v136_v7  ;;  %v86_v12 = vld [vmem:[#allocation5 + $0x60] sm:$0xff]  ;;  %248 = vmatpush.msra.mxu2 %v119_v6  ;;  %v85_v17 = vld [vmem:[#allocation5 + $0x58] sm:$0xff]  ;;  %v116_v20 = vld [vmem:[#allocation5 + $0x150] sm:$0xff] }
  0x14   :  { %227 = vmatpush.msra.mxu1 %v104_v9  ;;  %208 = vmatpush.msra.mxu0 %v87_v8  ;;  %v134_v14 = vld [vmem:[#allocation5 + $0x1e0] sm:$0xff]  ;;  %v133_v18 = vld [vmem:[#allocation5 + $0x1d8] sm:$0xff]  ;;  %v84_v21 = vld [vmem:[#allocation5 + $0x50] sm:$0xff] }
  0x15   :  { %v102_v15 = vld [vmem:[#allocation5 + $0xe0] sm:$0xff]  ;;  %268 = vmatpush.msra.mxu3 %v135_v10  ;;  %249 = vmatpush.msra.mxu2 %v118_v11  ;;  %v101_v19 = vld [vmem:[#allocation5 + $0xd8] sm:$0xff]  ;;  %v132_v22 = vld [vmem:[#allocation5 + $0x1d0] sm:$0xff] }
  0x16   :  { %228 = vmatpush.msra.mxu1 %v103_v13  ;;  %209 = vmatpush.msra.mxu0 %v86_v12  ;;  %v100_v23 = vld [vmem:[#allocation5 + $0xd0] sm:$0xff]  ;;  %v115_v24 = vld [vmem:[#allocation5 + $0x148] sm:$0xff]  ;;  %v114_v28 = vld [vmem:[#allocation5 + $0x140] sm:$0xff] }
  0x17   :  { %269 = vmatpush.msra.mxu3 %v134_v14  ;;  %250 = vmatpush.msra.mxu2 %v117_v16  ;;  %v83_v25 = vld [vmem:[#allocation5 + $0x48] sm:$0xff]  ;;  %v82_v29 = vld [vmem:[#allocation5 + $0x40] sm:$0xff]  ;;  %v113_v32 = vld [vmem:[#allocation5 + $0x138] sm:$0xff] }
  0x18   :  { %229 = vmatpush.msra.mxu1 %v102_v15  ;;  %210 = vmatpush.msra.mxu0 %v85_v17  ;;  %v131_v26 = vld [vmem:[#allocation5 + $0x1c8] sm:$0xff]  ;;  %v130_v30 = vld [vmem:[#allocation5 + $0x1c0] sm:$0xff]  ;;  %v81_v33 = vld [vmem:[#allocation5 + $0x38] sm:$0xff] }
  0x19   :  { %270 = vmatpush.msra.mxu3 %v133_v18  ;;  %251 = vmatpush.msra.mxu2 %v116_v20  ;;  %v99_v27 = vld [vmem:[#allocation5 + $0xc8] sm:$0xff]  ;;  %v98_v31 = vld [vmem:[#allocation5 + $0xc0] sm:$0xff]  ;;  %v129_v34 = vld [vmem:[#allocation5 + $0x1b8] sm:$0xff] }
  0x1a   :  { %230 = vmatpush.msra.mxu1 %v101_v19  ;;  %211 = vmatpush.msra.mxu0 %v84_v21  ;;  %v97_v35 = vld [vmem:[#allocation5 + $0xb8] sm:$0xff]  ;;  %v112_v36 = vld [vmem:[#allocation5 + $0x130] sm:$0xff]  ;;  %v111_v40 = vld [vmem:[#allocation5 + $0x128] sm:$0xff] }
  0x1b   :  { %271 = vmatpush.msra.mxu3 %v132_v22  ;;  %252 = vmatpush.msra.mxu2 %v115_v24  ;;  %v80_v37 = vld [vmem:[#allocation5 + $0x30] sm:$0xff]  ;;  %v79_v41 = vld [vmem:[#allocation5 + $0x28] sm:$0xff]  ;;  %v110_v44 = vld [vmem:[#allocation5 + $0x120] sm:$0xff] }
  0x1c   :  { %231 = vmatpush.msra.mxu1 %v100_v23  ;;  %212 = vmatpush.msra.mxu0 %v83_v25  ;;  %v128_v38 = vld [vmem:[#allocation5 + $0x1b0] sm:$0xff]  ;;  %v127_v42 = vld [vmem:[#allocation5 + $0x1a8] sm:$0xff]  ;;  %v78_v45 = vld [vmem:[#allocation5 + $0x20] sm:$0xff] }
  0x1d   :  { %272 = vmatpush.msra.mxu3 %v131_v26  ;;  %253 = vmatpush.msra.mxu2 %v114_v28  ;;  %v96_v39 = vld [vmem:[#allocation5 + $0xb0] sm:$0xff]  ;;  %v95_v43 = vld [vmem:[#allocation5 + $0xa8] sm:$0xff]  ;;  %v126_v46 = vld [vmem:[#allocation5 + $0x1a0] sm:$0xff] }
  0x1e   :  { %232 = vmatpush.msra.mxu1 %v99_v27  ;;  %213 = vmatpush.msra.mxu0 %v82_v29  ;;  %v94_v47 = vld [vmem:[#allocation5 + $0xa0] sm:$0xff]  ;;  %v109_v48 = vld [vmem:[#allocation5 + $0x118] sm:$0xff]  ;;  %v108_v52 = vld [vmem:[#allocation5 + $0x110] sm:$0xff] }
  0x1f   :  { %273 = vmatpush.msra.mxu3 %v130_v30  ;;  %254 = vmatpush.msra.mxu2 %v113_v32  ;;  %v77_v49 = vld [vmem:[#allocation5 + $0x18] sm:$0xff]  ;;  %v76_v53 = vld [vmem:[#allocation5 + $0x10] sm:$0xff]  ;;  %v107_v56 = vld [vmem:[#allocation5 + $0x108] sm:$0xff] }
  0x20   :  { %233 = vmatpush.msra.mxu1 %v98_v31  ;;  %214 = vmatpush.msra.mxu0 %v81_v33  ;;  %v125_v50 = vld [vmem:[#allocation5 + $0x198] sm:$0xff]  ;;  %v124_v54 = vld [vmem:[#allocation5 + $0x190] sm:$0xff]  ;;  %v75_v57 = vld [vmem:[#allocation5 + $0x8] sm:$0xff] }
  0x21   :  { %274 = vmatpush.msra.mxu3 %v129_v34  ;;  %255 = vmatpush.msra.mxu2 %v112_v36  ;;  %v93_v51 = vld [vmem:[#allocation5 + $0x98] sm:$0xff]  ;;  %v92_v55 = vld [vmem:[#allocation5 + $0x90] sm:$0xff]  ;;  %v123_v58 = vld [vmem:[#allocation5 + $0x188] sm:$0xff] }
  0x22   :  { %234 = vmatpush.msra.mxu1 %v97_v35  ;;  %215 = vmatpush.msra.mxu0 %v80_v37  ;;  %v91_v59 = vld [vmem:[#allocation5 + $0x88] sm:$0xff]  ;;  %v106_v60 = vld [vmem:[#allocation5 + $0x100] sm:$0xff]  ;;  %v185_v62 = vld [vmem:[#allocation5 + $0x378] sm:$0xff] }
  0x23   :  { %275 = vmatpush.msra.mxu3 %v128_v38  ;;  %256 = vmatpush.msra.mxu2 %v111_v40  ;;  %v74_v61 = vld [vmem:[#allocation5] sm:$0xff]  ;;  %v153_v0 = vld [vmem:[#allocation5 + $0x278] sm:$0xff]  ;;  %v184_v2 = vld [vmem:[#allocation5 + $0x370] sm:$0xff] }
  0x24   :  { %235 = vmatpush.msra.mxu1 %v96_v39  ;;  %216 = vmatpush.msra.mxu0 %v79_v41  ;;  %v122_v63 = vld [vmem:[#allocation5 + $0x180] sm:$0xff]  ;;  %v201_v1 = vld [vmem:[#allocation5 + $0x3f8] sm:$0xff]  ;;  %v152_v4 = vld [vmem:[#allocation5 + $0x270] sm:$0xff] }
  0x25   :  { %276 = vmatpush.msra.mxu3 %v127_v42  ;;  %257 = vmatpush.msra.mxu2 %v110_v44  ;;  %v90_v3 = vld [vmem:[#allocation5 + $0x80] sm:$0xff]  ;;  %v169_v5 = vld [vmem:[#allocation5 + $0x2f8] sm:$0xff]  ;;  %v183_v6 = vld [vmem:[#allocation5 + $0x368] sm:$0xff] }
  0x26   :  { %236 = vmatpush.msra.mxu1 %v95_v43  ;;  %217 = vmatpush.msra.mxu0 %v78_v45  ;;  %v200_v7 = vld [vmem:[#allocation5 + $0x3f0] sm:$0xff]  ;;  %v151_v8 = vld [vmem:[#allocation5 + $0x268] sm:$0xff]  ;;  %v182_v10 = vld [vmem:[#allocation5 + $0x360] sm:$0xff] }
  0x27   :  { %277 = vmatpush.msra.mxu3 %v126_v46  ;;  %258 = vmatpush.msra.mxu2 %v109_v48  ;;  %v168_v9 = vld [vmem:[#allocation5 + $0x2f0] sm:$0xff]  ;;  %v199_v11 = vld [vmem:[#allocation5 + $0x3e8] sm:$0xff]  ;;  %v150_v12 = vld [vmem:[#allocation5 + $0x260] sm:$0xff] }
  0x28   :  { %237 = vmatpush.msra.mxu1 %v94_v47  ;;  %218 = vmatpush.msra.mxu0 %v77_v49  ;;  %v167_v13 = vld [vmem:[#allocation5 + $0x2e8] sm:$0xff]  ;;  %v181_v14 = vld [vmem:[#allocation5 + $0x358] sm:$0xff]  ;;  %v198_v15 = vld [vmem:[#allocation5 + $0x3e0] sm:$0xff] }
  0x29   :  { %278 = vmatpush.msra.mxu3 %v125_v50  ;;  %259 = vmatpush.msra.mxu2 %v108_v52  ;;  %v149_v16 = vld [vmem:[#allocation5 + $0x258] sm:$0xff]  ;;  %v166_v17 = vld [vmem:[#allocation5 + $0x2e0] sm:$0xff]  ;;  %v180_v18 = vld [vmem:[#allocation5 + $0x350] sm:$0xff] }
  0x2a   :  { %238 = vmatpush.msra.mxu1 %v93_v51  ;;  %219 = vmatpush.msra.mxu0 %v76_v53  ;;  %v197_v19 = vld [vmem:[#allocation5 + $0x3d8] sm:$0xff]  ;;  %v148_v20 = vld [vmem:[#allocation5 + $0x250] sm:$0xff]  ;;  %v179_v22 = vld [vmem:[#allocation5 + $0x348] sm:$0xff] }
  0x2b   :  { %279 = vmatpush.msra.mxu3 %v124_v54  ;;  %260 = vmatpush.msra.mxu2 %v107_v56  ;;  %v165_v21 = vld [vmem:[#allocation5 + $0x2d8] sm:$0xff]  ;;  %v196_v23 = vld [vmem:[#allocation5 + $0x3d0] sm:$0xff]  ;;  %v147_v24 = vld [vmem:[#allocation5 + $0x248] sm:$0xff] }
  0x2c   :  { %239 = vmatpush.msra.mxu1 %v92_v55  ;;  %220 = vmatpush.msra.mxu0 %v75_v57  ;;  %v164_v25 = vld [vmem:[#allocation5 + $0x2d0] sm:$0xff]  ;;  %v178_v26 = vld [vmem:[#allocation5 + $0x340] sm:$0xff]  ;;  %v195_v27 = vld [vmem:[#allocation5 + $0x3c8] sm:$0xff] }
  0x2d   :  { %280 = vmatpush.msra.mxu3 %v123_v58  ;;  %261 = vmatpush.msra.mxu2 %v106_v60  ;;  %v146_v28 = vld [vmem:[#allocation5 + $0x240] sm:$0xff]  ;;  %v163_v29 = vld [vmem:[#allocation5 + $0x2c8] sm:$0xff]  ;;  %v177_v30 = vld [vmem:[#allocation5 + $0x338] sm:$0xff] }
  0x2e   :  { %240 = vmatpush.msra.mxu1 %v91_v59  ;;  %221 = vmatpush.msra.mxu0 %v74_v61  ;;  %v194_v31 = vld [vmem:[#allocation5 + $0x3c0] sm:$0xff]  ;;  %v145_v32 = vld [vmem:[#allocation5 + $0x238] sm:$0xff]  ;;  %v176_v34 = vld [vmem:[#allocation5 + $0x330] sm:$0xff] }
  0x2f   :  { %326 = vmatpush.msrb.mxu2 %v185_v62  ;;  %281 = vmatpush.msra.mxu3 %v122_v63  ;;  %v162_v33 = vld [vmem:[#allocation5 + $0x2c0] sm:$0xff]  ;;  %v193_v35 = vld [vmem:[#allocation5 + $0x3b8] sm:$0xff]  ;;  %v144_v36 = vld [vmem:[#allocation5 + $0x230] sm:$0xff] }
  0x30   :  { %286 = vmatpush.msrb.mxu0 %v153_v0  ;;  %241 = vmatpush.msra.mxu1 %v90_v3  ;;  %v161_v37 = vld [vmem:[#allocation5 + $0x2b8] sm:$0xff]  ;;  %v175_v38 = vld [vmem:[#allocation5 + $0x328] sm:$0xff]  ;;  %v192_v39 = vld [vmem:[#allocation5 + $0x3b0] sm:$0xff] }
  0x31   :  { %346 = vmatpush.msrb.mxu3 %v201_v1  ;;  %327 = vmatpush.msrb.mxu2 %v184_v2  ;;  %v143_v40 = vld [vmem:[#allocation5 + $0x228] sm:$0xff]  ;;  %v160_v41 = vld [vmem:[#allocation5 + $0x2b0] sm:$0xff]  ;;  %v174_v42 = vld [vmem:[#allocation5 + $0x320] sm:$0xff] }
  0x32   :  { %287 = vmatpush.msrb.mxu0 %v152_v4  ;;  %306 = vmatpush.msrb.mxu1 %v169_v5  ;;  %v191_v43 = vld [vmem:[#allocation5 + $0x3a8] sm:$0xff]  ;;  %v68_v44 = vld [vmem:[#allocation2 + $0x10] sm:$0xff]  ;;  %v142_v45 = vld [vmem:[#allocation5 + $0x220] sm:$0xff] }
  0x33   :  { %328 = vmatpush.msrb.mxu2 %v183_v6  ;;  %347 = vmatpush.msrb.mxu3 %v200_v7  ;;  %v159_v46 = vld [vmem:[#allocation5 + $0x2a8] sm:$0xff]  ;;  %v173_v47 = vld [vmem:[#allocation5 + $0x318] sm:$0xff]  ;;  %v190_v48 = vld [vmem:[#allocation5 + $0x3a0] sm:$0xff] }
  0x34   :  { %288 = vmatpush.msrb.mxu0 %v151_v8  ;;  %307 = vmatpush.msrb.mxu1 %v168_v9  ;;  %v66_v49 = vld [vmem:[#allocation2] sm:$0xff]  ;;  %v69_v50 = vld [vmem:[#allocation2 + $0x18] sm:$0xff]  ;;  %v172_v53 = vld [vmem:[#allocation5 + $0x310] sm:$0xff] }
  0x35   :  { %329 = vmatpush.msrb.mxu2 %v182_v10  ;;  %348 = vmatpush.msrb.mxu3 %v199_v11  ;;  %v141_v51 = vld [vmem:[#allocation5 + $0x218] sm:$0xff]  ;;  %v158_v52 = vld [vmem:[#allocation5 + $0x2a0] sm:$0xff]  ;;  %v67_v55 = vld [vmem:[#allocation2 + $0x8] sm:$0xff] }
  0x36   :  { %289 = vmatpush.msrb.mxu0 %v150_v12  ;;  %308 = vmatpush.msrb.mxu1 %v167_v13  ;;  %v189_v54 = vld [vmem:[#allocation5 + $0x398] sm:$0xff]  ;;  %v140_v56 = vld [vmem:[#allocation5 + $0x210] sm:$0xff]  ;;  %v171_v58 = vld [vmem:[#allocation5 + $0x308] sm:$0xff] }
  0x37   :  { %330 = vmatpush.msrb.mxu2 %v181_v14  ;;  %349 = vmatpush.msrb.mxu3 %v198_v15  ;;  %v157_v57 = vld [vmem:[#allocation5 + $0x298] sm:$0xff]  ;;  %v188_v59 = vld [vmem:[#allocation5 + $0x390] sm:$0xff]  ;;  %v139_v60 = vld [vmem:[#allocation5 + $0x208] sm:$0xff] }
  0x38   :  { %290 = vmatpush.msrb.mxu0 %v149_v16  ;;  %309 = vmatpush.msrb.mxu1 %v166_v17  ;;  %v156_v61 = vld [vmem:[#allocation5 + $0x290] sm:$0xff]  ;;  %v170_v62 = vld [vmem:[#allocation5 + $0x300] sm:$0xff]  ;;  %v187_v63 = vld [vmem:[#allocation5 + $0x388] sm:$0xff] }
  0x39   :  { %331 = vmatpush.msrb.mxu2 %v180_v18  ;;  %350 = vmatpush.msrb.mxu3 %v197_v19  ;;  %v72_v0 = vld [vmem:[#allocation2 + $0x30] sm:$0xff]  ;;  %v138_v1 = vld [vmem:[#allocation5 + $0x200] sm:$0xff]  ;;  %v155_v2 = vld [vmem:[#allocation5 + $0x288] sm:$0xff] }
  0x3a   :  { %291 = vmatpush.msrb.mxu0 %v148_v20  ;;  %310 = vmatpush.msrb.mxu1 %v165_v21  ;;  %v186_v3 = vld [vmem:[#allocation5 + $0x380] sm:$0xff]  ;;  %v73_v5 = vld [vmem:[#allocation2 + $0x38] sm:$0xff]  ;;  %v71_v8 = vld [vmem:[#allocation2 + $0x28] sm:$0xff] }
  0x3b   :  { %332 = vmatpush.msrb.mxu2 %v179_v22  ;;  %351 = vmatpush.msrb.mxu3 %v196_v23  ;;  %v70_v4 = vld [vmem:[#allocation2 + $0x20] sm:$0xff]  ;;  %v382_v7 = vld [vmem:[#allocation7 + $0x78] sm:$0xff]  ;;  %v381_v9 = vld [vmem:[#allocation7 + $0x70] sm:$0xff] }
  0x3c   :  { %292 = vmatpush.msrb.mxu0 %v147_v24  ;;  %311 = vmatpush.msrb.mxu1 %v164_v25  ;;  %v154_v6 = vld [vmem:[#allocation5 + $0x280] sm:$0xff]  ;;  %v380_v10 = vld [vmem:[#allocation7 + $0x68] sm:$0xff]  ;;  %v378_v12 = vld [vmem:[#allocation7 + $0x58] sm:$0xff] }
  0x3d   :  { %333 = vmatpush.msrb.mxu2 %v178_v26  ;;  %352 = vmatpush.msrb.mxu3 %v195_v27  ;;  %v379_v11 = vld [vmem:[#allocation7 + $0x60] sm:$0xff]  ;;  %v377_v13 = vld [vmem:[#allocation7 + $0x50] sm:$0xff]  ;;  %v376_v14 = vld [vmem:[#allocation7 + $0x48] sm:$0xff] }
  0x3e   :  { %293 = vmatpush.msrb.mxu0 %v146_v28  ;;  %312 = vmatpush.msrb.mxu1 %v163_v29  ;;  %v375_v15 = vld [vmem:[#allocation7 + $0x40] sm:$0xff]  ;;  %v374_v16 = vld [vmem:[#allocation7 + $0x38] sm:$0xff]  ;;  %v373_v17 = vld [vmem:[#allocation7 + $0x30] sm:$0xff] }
  0x3f   :  { %334 = vmatpush.msrb.mxu2 %v177_v30  ;;  %353 = vmatpush.msrb.mxu3 %v194_v31  ;;  %v372_v18 = vld [vmem:[#allocation7 + $0x28] sm:$0xff]  ;;  %v371_v19 = vld [vmem:[#allocation7 + $0x20] sm:$0xff]  ;;  %v370_v20 = vld [vmem:[#allocation7 + $0x18] sm:$0xff] }
  0x40   :  { %294 = vmatpush.msrb.mxu0 %v145_v32  ;;  %313 = vmatpush.msrb.mxu1 %v162_v33  ;;  %v369_v21 = vld [vmem:[#allocation7 + $0x10] sm:$0xff]  ;;  %v368_v22 = vld [vmem:[#allocation7 + $0x8] sm:$0xff]  ;;  %v367_v23 = vld [vmem:[#allocation7] sm:$0xff] }
  0x41   :  { %335 = vmatpush.msrb.mxu2 %v176_v34  ;;  %354 = vmatpush.msrb.mxu3 %v193_v35  ;;  %v432_v24 = vld [vmem:[%s592_s2] ss:$0 sm:$0xff] }
  0x42   :  { %295 = vmatpush.msrb.mxu0 %v144_v36  ;;  %314 = vmatpush.msrb.mxu1 %v161_v37 }
  0x43   :  { %336 = vmatpush.msrb.mxu2 %v175_v38  ;;  %355 = vmatpush.msrb.mxu3 %v192_v39 }
  0x44   :  { %296 = vmatpush.msrb.mxu0 %v143_v40  ;;  %315 = vmatpush.msrb.mxu1 %v160_v41 }
  0x45   :  { %337 = vmatpush.msrb.mxu2 %v174_v42  ;;  %356 = vmatpush.msrb.mxu3 %v191_v43  ;;  %v433_v42 = vld [vmem:[%s594_s4] ss:$0 sm:$0xff] }
  0x46   :  { %262 = vmatmul.f32.vlgmr.msra.gmra.mxu2 %v68_v44  ;;  %297 = vmatpush.msrb.mxu0 %v142_v45 }
  0x47   :  { %316 = vmatpush.msrb.mxu1 %v159_v46  ;;  %338 = vmatpush.msrb.mxu2 %v173_v47 }
  0x48   :  { %357 = vmatpush.msrb.mxu3 %v190_v48  ;;  %222 = vmatmul.f32.vlgmr.msra.gmra.mxu0 %v66_v49 }
  0x49   :  { %282 = vmatmul.f32.vlgmr.msra.gmra.mxu3 %v69_v50  ;;  %298 = vmatpush.msrb.mxu0 %v141_v51 }
  0x4a   :  { %317 = vmatpush.msrb.mxu1 %v158_v52  ;;  %339 = vmatpush.msrb.mxu2 %v172_v53 }
  0x4b   :  { %358 = vmatpush.msrb.mxu3 %v189_v54  ;;  %242 = vmatmul.f32.vlgmr.msra.gmra.mxu1 %v67_v55 }
  0x4c   :  { %299 = vmatpush.msrb.mxu0 %v140_v56  ;;  %318 = vmatpush.msrb.mxu1 %v157_v57 }
  0x4d   :  { %340 = vmatpush.msrb.mxu2 %v171_v58  ;;  %359 = vmatpush.msrb.mxu3 %v188_v59 }
  0x4e   :  { %300 = vmatpush.msrb.mxu0 %v139_v60  ;;  %319 = vmatpush.msrb.mxu1 %v156_v61 }
  0x4f   :  { %341 = vmatpush.msrb.mxu2 %v170_v62  ;;  %360 = vmatpush.msrb.mxu3 %v187_v63 }
  0x50   :  { %342 = vmatmul.f32.vlgmr.msrb.gmra.mxu2 %v72_v0  ;;  %301 = vmatpush.msrb.mxu0 %v138_v1 }
  0x51   :  { %320 = vmatpush.msrb.mxu1 %v155_v2  ;;  %361 = vmatpush.msrb.mxu3 %v186_v3 }
  0x52   :  { %302 = vmatmul.f32.vlgmr.msrb.gmra.mxu0 %v70_v4  ;;  %362 = vmatmul.f32.vlgmr.msrb.gmra.mxu3 %v73_v5 }
  0x53   :  { %321 = vmatpush.msrb.mxu1 %v154_v6  ;;  %387 = vmatpush.msra.mxu0 %v382_v7 }
  0x54   :  { %322 = vmatmul.f32.vlgmr.msrb.gmra.mxu1 %v71_v8 }
  0x55   :  { %388 = vmatpush.msra.mxu0 %v381_v9 }
  0x57   :  { %389 = vmatpush.msra.mxu0 %v380_v10 }
  0x59   :  { %390 = vmatpush.msra.mxu0 %v379_v11 }
  0x5b   :  { %391 = vmatpush.msra.mxu0 %v378_v12 }
  0x5d   :  { %392 = vmatpush.msra.mxu0 %v377_v13 }
  0x5f   :  { %393 = vmatpush.msra.mxu0 %v376_v14 }
  0x61   :  { %394 = vmatpush.msra.mxu0 %v375_v15 }
  0x63   :  { %395 = vmatpush.msra.mxu0 %v374_v16 }
  0x65   :  { %396 = vmatpush.msra.mxu0 %v373_v17 }
  0x67   :  { %397 = vmatpush.msra.mxu0 %v372_v18 }
  0x69   :  { %398 = vmatpush.msra.mxu0 %v371_v19 }
  0x6b   :  { %399 = vmatpush.msra.mxu0 %v370_v20 }
  0x6d   :  { %400 = vmatpush.msra.mxu0 %v369_v21 }
  0x6f   :  { %401 = vmatpush.msra.mxu0 %v368_v22 }
  0x71   :  { %402 = vmatpush.msra.mxu0 %v367_v23 }
  0xc5   :  { %v223_v25 = vpop.f32.mrf.mxu0 }
  0xc6   :  { %v224_v26 = vadd.f32 %v432_v24, %v223_v25 }
  0xc8   :  { %v243_v27 = vpop.f32.mrf.mxu1 }
  0xc9   :  { %v244_v28 = vadd.f32 %v243_v27, %v224_v26  ;;  %v263_v29 = vpop.f32.mrf.mxu2 }
  0xcb   :  { %v264_v30 = vadd.f32 %v263_v29, %v244_v28 }
  0xcc   :  { %v283_v31 = vpop.f32.mrf.mxu3 }
  0xcd   :  { %v284_v32 = vadd.f32 %v283_v31, %v264_v30 }
  0xcf   :  { %v303_v33 = vpop.f32.mrf.mxu0 }
  0xd0   :  { %v304_v34 = vadd.f32 %v303_v33, %v284_v32 }
  0xd1   :  { %v323_v35 = vpop.f32.mrf.mxu1 }
  0xd2   :  { %v324_v36 = vadd.f32 %v323_v35, %v304_v34 }
  0xd3   :  { %v343_v37 = vpop.f32.mrf.mxu2 }
  0xd4   :  { %v344_v38 = vadd.f32 %v343_v37, %v324_v36 }
  0xd5   :  { %v363_v39 = vpop.f32.mrf.mxu3 }
  0xd6   :  { %v364_v40 = vadd.f32 %v363_v39, %v344_v38 }
  0xd8   :  { %v366_v41 = vmax.f32 %v364_v40, 0.0 }
  0xda   :  { %403 = vmatmul.f32.vlgmr.msra.gmra.mxu0 %v366_v41 }
 0x157   :  { %v404_v43 = vpop.f32.mrf.mxu0 }
 0x158   :  { %v405_v44 = vadd.f32 %v433_v42, %v404_v43 }
 0x15a   :  { %407 = vst [vmem:[#allocation8] sm:$0xff] %v405_v44 }
 0x15b   :  { %418 = dma.vmem_to_hbm [thread:$0]  %s414_s11, 128, %s416_s14, [#allocation4]  }
 0x15c   :  { %534 = dma.done.wait [#allocation4], 128  }
 0x15d   :  { %535 = vsyncadd [#allocation4], 4294967168 }
 0x15e   :  { %423 = vsyncpa [#allocation3], 1 }
 0x15f   :  { %424 = vsyncpa [#allocation6], 1 }
 0x160   :  { %425 = vsyncpa [#allocation4], 1 }

</bundles_post_ra>
